<compile_context>
chip_gen: v6e
topology: v6e:2x2x1
jax: 0.10.0
libtpu: 0.0.40
codegen_flags: <defaults>
</compile_context>

<pallas_src>
import functools

import jax
import jax.numpy as jnp
from jax.experimental import pallas as pl
from jax.experimental.pallas import tpu as pltpu

LEAKY_SLOPE = 0.01
BN_EPS = 1e-5


# ----------------------------------------------------------------------------- kernels
def _conv_rows(x_ref, w_ref, row0, tile_h, taps):
    """Conv for `tile_h` output rows of one W tile.

    x_ref : (1, 1, Hp, Wtp*Cin)    bf16, padded image slab of this (batch, W-tile)
    w_ref : (KH, Wtp*Cin, Wt*Cout) bf16, banded per-kh weight
    Loads the (tile_h + taps - 1)-row LHS slab ONCE and takes the kh row windows
    from the loaded value (XLU shifts) instead of `taps` overlapping unaligned
    VMEM loads; accumulates the KH matmuls in f32 on the MXU.
    """
    lanes = w_ref.shape[-1]
    slab = x_ref[0, 0, pl.ds(row0, tile_h + taps - 1), :]
    acc = jnp.zeros((tile_h, lanes), jnp.float32)
    for kh in range(taps):                         # static unroll over the KH row taps
        acc = acc + jnp.dot(slab[kh:kh + tile_h, :], w_ref[kh],
                            preferred_element_type=jnp.float32)
    return acc


def _stats_update(stats_ref, acc, h):
    """Accumulate (sum, sum_sq) over the H-tile axis directly in the output block."""
    part = jnp.concatenate([jnp.sum(acc, axis=0, keepdims=True),
                            jnp.sum(acc * acc, axis=0, keepdims=True)], axis=0)

    @pl.when(h == 0)
    def _():
        stats_ref[0, 0] = part

    @pl.when(h > 0)
    def _():
        stats_ref[0, 0] += part


def _conv_stats_kernel(x_ref, w_ref, stats_ref, *, tile_h, taps):
    """Phase 1 (recompute flavour): conv tile -> (sum, sum_sq) accumulated over h."""
    h = pl.program_id(2)
    acc = _conv_rows(x_ref, w_ref, pl.multiple_of(h * tile_h, tile_h), tile_h, taps)
    _stats_update(stats_ref, acc, h)


def _conv_store_stats_kernel(x_ref, w_ref, y_ref, stats_ref, *, tile_h, taps):
    """Phase 1 (store flavour): conv tile -> bf16 activation + accumulated stats."""
    h = pl.program_id(2)
    acc = _conv_rows(x_ref, w_ref, pl.multiple_of(h * tile_h, tile_h), tile_h, taps)
    y_ref[0, 0] = acc.astype(y_ref.dtype)
    _stats_update(stats_ref, acc, h)


def _conv_bn_act_kernel(x_ref, w_ref, scale_ref, shift_ref, o_ref, *, tile_h, taps):
    """Phase 2 (recompute flavour): redo conv, folded BN scale/shift, LeakyReLU."""
    h = pl.program_id(2)
    acc = _conv_rows(x_ref, w_ref, pl.multiple_of(h * tile_h, tile_h), tile_h, taps)
    y = acc * scale_ref[...] + shift_ref[...]
    o_ref[0, 0] = jnp.where(y >= 0, y, LEAKY_SLOPE * y).astype(o_ref.dtype)


def _bn_act_kernel(y_ref, scale_ref, shift_ref, o_ref):
    """Phase 2 (store flavour): pure VPU pass over the stored bf16 conv activation."""
    y = y_ref[0, 0].astype(jnp.float32) * scale_ref[...] + shift_ref[...]
    o_ref[0, 0] = jnp.where(y >= 0, y, LEAKY_SLOPE * y).astype(o_ref.dtype)


# ----------------------------------------------------------------------------- tiling
def _pick_tile_w(W, Cout, lane_target=256):
    """Smallest divisor Wt of W with Wt*Cout >= min(lane_target, W*Cout), preferring a
    multiple of 128 lanes.

    lane_target=256 fills the 256-wide MXUs of v6e/v7x (two passes on v5e's 128-wide
    MXU, harmless); a small Wt bounds the band's structural-zero waste
    ((Wt + 2*pad)/KW) and keeps the band O(Wt^2*Cin*Cout) instead of O(W^2*Cin*Cout).
    """
    target = min(lane_target, W * Cout)
    divs = [wt for wt in range(1, W + 1) if W % wt == 0 and wt * Cout >= target]
    aligned = [wt for wt in divs if (wt * Cout) % 128 == 0]
    return min(aligned or divs or [W])


def _pick_tile_h(H, lane_w, max_tile_bytes=2 << 20):
    """Largest multiple-of-8 divisor of H whose f32 (tile_h, lane_w) tile fits the
    VMEM byte cap -- big M for the MXU, few grid steps, amortized weight pushes."""
    max_rows = max(8, max_tile_bytes // (4 * lane_w))
    cands = [d for d in range(8, H + 1, 8) if H % d == 0 and d <= max_rows]
    if cands:
        return max(cands)
    # Only reached when H has no multiple-of-8 divisor (H % 8 != 0): the (8,128) block
    # rule then forces tile_h == H.
    # TODO(synk): pad H up to a multiple of 8 in the wrapper for huge non-8-divisible H.
    return H


def _build_w_band(weight_oihw, tile_w, kernel_size, pad):
    """Banded per-kh weight for one W tile:
         w_band[kh, win*Cin+ci, wl*Cout+co] = weight[co, ci, kh, win-wl]
       (zero unless win-wl in [0, KW)), win in [0, Wt+2*pad), wl in [0, Wt).
    Identical for every W tile (translation invariance).  For static (inference)
    weights this is a compile-time constant under jit and can be hoisted/cached."""
    KH = KW = kernel_size
    wt = jnp.transpose(weight_oihw, (2, 3, 1, 0)).astype(jnp.float32)  # (KH,KW,Cin,Cout)
    Cin, Cout = wt.shape[2], wt.shape[3]
    band = (jnp.arange(tile_w + 2 * pad)[:, None, None]
            == jnp.arange(tile_w)[None, None, :] + jnp.arange(KW)[None, :, None]
            ).astype(jnp.float32)                                       # (Wtp, KW, Wt)
    w_band = jnp.einsum("ikw,hkco->hicwo", band, wt)                    # (KH,Wtp,Cin,Wt,Cout)
    return w_band.reshape(KH, (tile_w + 2 * pad) * Cin, tile_w * Cout).astype(jnp.bfloat16)


# ----------------------------------------------------------------------------- wrapper
def conv2d_block(x_nchw, weight_oihw, gamma, beta, *, kernel_size=3, upsample=False,
                 tile_h=None, tile_w=None, store_conv=None, out_dtype=jnp.float32):
    """Forward pass of Conv2dBlock (defaults: stride=1, bias=False, bn=True, LeakyReLU).
    BatchNorm uses global batch statistics (training-mode BN)."""
    x = jnp.transpose(x_nchw, (0, 2, 3, 1))                       # NCHW -> NHWC
    if upsample:
        # TODO(synk): jax.image.resize bilinear is close to but not bitwise identical
        # to F.interpolate(align_corners=False).
        n, h, w, c = x.shape
        x = jax.image.resize(x.astype(jnp.float32), (n, 2 * h, 2 * w, c), method="bilinear")
    x = x.astype(jnp.bfloat16)                                     # cast BEFORE pad/stack glue

    pad = (kernel_size - 1) // 2
    xp = jnp.pad(x, ((0, 0), (pad, pad), (pad, pad), (0, 0)))
    N, Hp, Wp, Cin = xp.shape
    H, W = Hp - 2 * pad, Wp - 2 * pad
    Cout = weight_oihw.shape[0]
    KH = kernel_size

    # --- tile selection -------------------------------------------------------
    if tile_w is None:
        tile_w = _pick_tile_w(W, Cout)
    assert W % tile_w == 0, (W, tile_w)
    nw = W // tile_w
    wcout = tile_w * Cout                                          # output lane width
    wtp_cin = (tile_w + 2 * pad) * Cin                             # contraction depth per kh

    if tile_h is None:
        tile_h = _pick_tile_h(H, wcout)
    assert H % tile_h == 0 and (tile_h == H or tile_h % 8 == 0), (H, tile_h)
    nh = H // tile_h

    if store_conv is None:
        # Recompute the conv in phase 2 only when re-reading the cheap bf16 input
        # (2*Cin B/elem) clearly beats a bf16 activation write+read (4*Cout B/elem)
        # plus the extra MXU work; otherwise store the bf16 activation.
        store_conv = (2 * Cin >= Cout) or (W > 512)

    # --- glue: per-W-tile input slabs, lane-folded (bf16) ----------------------
    x_tiles = jnp.stack(
        [xp[:, :, j * tile_w: j * tile_w + tile_w + 2 * pad, :] for j in range(nw)],
        axis=1).reshape(N, nw, Hp, wtp_cin)

    # --- glue: per-W-tile banded weight (same band for every tile) -------------
    w_band = _build_w_band(weight_oihw, tile_w, kernel_size, pad)

    grid = (N, nw, nh)
    x_spec = pl.BlockSpec((1, 1, Hp, wtp_cin), lambda n, wj, h: (n, wj, 0, 0))  # resident over h
    # TODO(synk): pl.Buffered(1) pipeline_mode on w_spec would drop the redundant second
    # buffer of this constant-index block (extra VMEM relief on v7x).
    w_spec = pl.BlockSpec((KH, wtp_cin, wcout), lambda n, wj, h: (0, 0, 0))
    row_spec = pl.BlockSpec((1, wcout), lambda n, wj, h: (0, 0))
    stats_spec = pl.BlockSpec((1, 1, 2, wcout), lambda n, wj, h: (n, wj, 0, 0))  # acc over h
    ytile_spec = pl.BlockSpec((1, 1, tile_h, wcout), lambda n, wj, h: (n, wj, h, 0))

    # vmem_limit derived from the actual (double-buffered) block footprints; stays well
    # inside v7x's 64 MiB VMEM and the 128 MiB of v5e/v6e.
    blk_bytes = (Hp * wtp_cin * 2 + KH * wtp_cin * wcout * 2
                 + tile_h * wcout * (4 + 2) + 4 * wcout * 4)
    vmem_limit = int(min(60 << 20, max(16 << 20, 8 * blk_bytes)))
    sem_acc = pltpu.CompilerParams(
        dimension_semantics=("parallel", "parallel", "arbitrary"),
        vmem_limit_bytes=vmem_limit)
    sem_par = pltpu.CompilerParams(
        dimension_semantics=("parallel", "parallel", "parallel"),
        vmem_limit_bytes=vmem_limit)

    # --- phase 1: conv -> per-(batch, W-tile) (sum, sum_sq), accumulated over h -
    stats_shape = jax.ShapeDtypeStruct((N, nw, 2, wcout), jnp.float32)
    if store_conv:
        y_conv, stats = pl.pallas_call(
            functools.partial(_conv_store_stats_kernel, tile_h=tile_h, taps=KH),
            out_shape=(jax.ShapeDtypeStruct((N, nw, H, wcout), jnp.bfloat16), stats_shape),
            grid=grid,
            in_specs=[x_spec, w_spec],
            out_specs=[ytile_spec, stats_spec],
            compiler_params=sem_acc,
        )(x_tiles, w_band)
    else:
        y_conv = None
        stats = pl.pallas_call(
            functools.partial(_conv_stats_kernel, tile_h=tile_h, taps=KH),
            out_shape=stats_shape,
            grid=grid,
            in_specs=[x_spec, w_spec],
            out_specs=stats_spec,
            compiler_params=sem_acc,
        )(x_tiles, w_band)

    # --- glue: fold global batch statistics + affine into one scale/shift ------
    # TODO(synk): E[x^2]-mean^2 in f32 can cancel when |mean| >> std; a Welford /
    # shifted-sum accumulation in-kernel would be the robust fix.
    st = stats.reshape(N, nw, 2, tile_w, Cout)
    count = N * H * W
    mean = st[:, :, 0].sum(axis=(0, 1, 2)) / count
    var = jnp.maximum(st[:, :, 1].sum(axis=(0, 1, 2)) / count - mean * mean, 0.0)
    scale = gamma.astype(jnp.float32) * jax.lax.rsqrt(var + BN_EPS)
    shift = beta.astype(jnp.float32) - mean * scale
    scale_row = jnp.tile(scale, tile_w).reshape(1, wcout)   # matches wl*Cout+co lane layout
    shift_row = jnp.tile(shift, tile_w).reshape(1, wcout)

    # --- phase 2: BN scale/shift + LeakyReLU ------------------------------------
    out_shape = jax.ShapeDtypeStruct((N, nw, H, wcout), out_dtype)
    if store_conv:
        y = pl.pallas_call(
            _bn_act_kernel,
            out_shape=out_shape,
            grid=grid,
            in_specs=[ytile_spec, row_spec, row_spec],
            out_specs=ytile_spec,
            compiler_params=sem_par,
        )(y_conv, scale_row, shift_row)
    else:
        y = pl.pallas_call(
            functools.partial(_conv_bn_act_kernel, tile_h=tile_h, taps=KH),
            out_shape=out_shape,
            grid=grid,
            in_specs=[x_spec, w_spec, row_spec, row_spec],
            out_specs=ytile_spec,
            compiler_params=sem_par,
        )(x_tiles, w_band, scale_row, shift_row)

    # Folded NHWC -> NCHW.  TODO(synk): keep NHWC / bf16 (out_dtype) for the next layer
    # to avoid this transpose + f32 bytes when chaining blocks.
    y = y.reshape(N, nw, H, tile_w, Cout)
    return jnp.transpose(y, (0, 4, 2, 1, 3)).reshape(N, Cout, H, W)

# TODO(synk): stride != 1, bias=True and bn=False paths of Conv2dBlock are not exercised
# by the default module config and are not implemented here.


def _reference(x_nchw, weight_oihw, gamma, beta):
    """Pure-JAX reference mirroring the PyTorch forward (default config)."""
    y = jax.lax.conv_general_dilated(
        x_nchw, weight_oihw, window_strides=(1, 1), padding=((1, 1), (1, 1)),
        dimension_numbers=("NCHW", "OIHW", "NCHW"))
    mean = jnp.mean(y, axis=(0, 2, 3), keepdims=True)
    var = jnp.mean((y - mean) ** 2, axis=(0, 2, 3), keepdims=True)
    y = (y - mean) * jax.lax.rsqrt(var + BN_EPS)
    y = y * gamma.reshape(1, -1, 1, 1) + beta.reshape(1, -1, 1, 1)
    return jnp.where(y >= 0, y, LEAKY_SLOPE * y)


if __name__ == "__main__":
    key = jax.random.PRNGKey(0)
    k_x, k_w, k_g, k_b = jax.random.split(key, 4)

    N, Cin, Cout, H, W = 2, 4, 8, 16, 16
    x = jax.random.normal(k_x, (N, Cin, H, W), jnp.float32)
    weight = jax.random.normal(k_w, (Cout, Cin, 3, 3), jnp.float32) * 0.1
    gamma = 1.0 + 0.1 * jax.random.normal(k_g, (Cout,), jnp.float32)
    beta = 0.1 * jax.random.normal(k_b, (Cout,), jnp.float32)

    ref = jax.block_until_ready(_reference(x, weight, gamma, beta))

    configs = [
        dict(),                                        # auto tiles (single H/W tile), auto phase-2
        dict(tile_h=8, tile_w=8, store_conv=False),    # multi H/W tiles, conv recompute path
        dict(tile_h=8, tile_w=8, store_conv=True),     # multi H/W tiles, stored bf16 activation
    ]
    for cfg in configs:
        out = conv2d_block(x, weight, gamma, beta, kernel_size=3, upsample=False, **cfg)
        out = jax.block_until_ready(out)
        assert out.shape == (N, Cout, H, W), (cfg, out.shape)
        err = float(jnp.max(jnp.abs(out - ref)))
        # bf16 conv operands -> slightly looser tolerance than a pure-f32 path
        assert jnp.allclose(out, ref, atol=5e-2, rtol=5e-2), (cfg, err)

    print("KERNEL_OK")
</pallas_src>

<mosaic_0001>
module attributes {stable_mosaic.version = 11 : i64} {
  func.func @_conv_store_stats_kernel(%arg0: i32, %arg1: i32, %arg2: i32, %arg3: memref<1x1x18x72xbf16, #tpu.memory_space<vmem>>, %arg4: memref<3x72x128xbf16, #tpu.memory_space<vmem>>, %arg5: memref<1x1x16x128xbf16, #tpu.memory_space<vmem>>, %arg6: memref<1x1x2x128xf32, #tpu.memory_space<vmem>>) attributes {dimension_semantics = [#tpu.dimension_semantics<parallel>, #tpu.dimension_semantics<parallel>, #tpu.dimension_semantics<arbitrary>], iteration_bounds = array<i64: 2, 1, 1>, scalar_prefetch = 0 : i64, scratch_operands = 0 : i64, tpu.core_type = #tpu.core_type<tc>, window_params = [{transform_indices = @transform_0, window_bounds = array<i64: 1, 1, 18, 72>}, {pipeline_mode = #tpu.pipeline_mode<synchronous>, transform_indices = @transform_1, window_bounds = array<i64: 3, 72, 128>}, {transform_indices = @transform_2, window_bounds = array<i64: 1, 1, 16, 128>}, {transform_indices = @transform_3, window_bounds = array<i64: 1, 1, 2, 128>}]} {
    %c16_i32 = arith.constant 16 : i32
    %0 = arith.muli %arg2, %c16_i32 : i32
    %1 = tpu.assume_multiple %0, 16 : i32
    %c0 = arith.constant 0 : index
    %c0_0 = arith.constant 0 : index
    %2 = arith.index_cast %1 : i32 to index
    %c0_1 = arith.constant 0 : index
    %3 = vector.load %arg3[%c0, %c0_0, %2, %c0_1] : memref<1x1x18x72xbf16, #tpu.memory_space<vmem>>, vector<1x1x18x72xbf16>
    %4 = vector.shape_cast %3 : vector<1x1x18x72xbf16> to vector<18x72xbf16>
    %cst = arith.constant 0.000000e+00 : f32
    %5 = vector.broadcast %cst : f32 to vector<16x128xf32>
    %6 = vector.extract_strided_slice %4 {offsets = [0, 0], sizes = [16, 72], strides = [1, 1]} : vector<18x72xbf16> to vector<16x72xbf16>
    %c0_2 = arith.constant 0 : index
    %c0_3 = arith.constant 0 : index
    %c0_4 = arith.constant 0 : index
    %7 = vector.load %arg4[%c0_2, %c0_3, %c0_4] : memref<3x72x128xbf16, #tpu.memory_space<vmem>>, vector<1x72x128xbf16>
    %8 = vector.shape_cast %7 : vector<1x72x128xbf16> to vector<72x128xbf16>
    %cst_5 = arith.constant dense<0.000000e+00> : vector<16x128xf32>
    %9 = tpu.matmul %6, %8, %cst_5 {dimension_numbers = #tpu.dot_dimension_numbers<[1], [0], [0], [1], [0, 0, 1, 1], [], []>} : vector<16x72xbf16>, vector<72x128xbf16>, vector<16x128xf32> -> vector<16x128xf32>
    %10 = arith.addf %5, %9 : vector<16x128xf32>
    %11 = vector.extract_strided_slice %4 {offsets = [1, 0], sizes = [16, 72], strides = [1, 1]} : vector<18x72xbf16> to vector<16x72xbf16>
    %c1 = arith.constant 1 : index
    %c0_6 = arith.constant 0 : index
    %c0_7 = arith.constant 0 : index
    %12 = vector.load %arg4[%c1, %c0_6, %c0_7] : memref<3x72x128xbf16, #tpu.memory_space<vmem>>, vector<1x72x128xbf16>
    %13 = vector.shape_cast %12 : vector<1x72x128xbf16> to vector<72x128xbf16>
    %cst_8 = arith.constant dense<0.000000e+00> : vector<16x128xf32>
    %14 = tpu.matmul %11, %13, %cst_8 {dimension_numbers = #tpu.dot_dimension_numbers<[1], [0], [0], [1], [0, 0, 1, 1], [], []>} : vector<16x72xbf16>, vector<72x128xbf16>, vector<16x128xf32> -> vector<16x128xf32>
    %15 = arith.addf %10, %14 : vector<16x128xf32>
    %16 = vector.extract_strided_slice %4 {offsets = [2, 0], sizes = [16, 72], strides = [1, 1]} : vector<18x72xbf16> to vector<16x72xbf16>
    %c2 = arith.constant 2 : index
    %c0_9 = arith.constant 0 : index
    %c0_10 = arith.constant 0 : index
    %17 = vector.load %arg4[%c2, %c0_9, %c0_10] : memref<3x72x128xbf16, #tpu.memory_space<vmem>>, vector<1x72x128xbf16>
    %18 = vector.shape_cast %17 : vector<1x72x128xbf16> to vector<72x128xbf16>
    %cst_11 = arith.constant dense<0.000000e+00> : vector<16x128xf32>
    %19 = tpu.matmul %16, %18, %cst_11 {dimension_numbers = #tpu.dot_dimension_numbers<[1], [0], [0], [1], [0, 0, 1, 1], [], []>} : vector<16x72xbf16>, vector<72x128xbf16>, vector<16x128xf32> -> vector<16x128xf32>
    %20 = arith.addf %15, %19 : vector<16x128xf32>
    %21 = arith.truncf %20 : vector<16x128xf32> to vector<16x128xbf16>
    %c0_12 = arith.constant 0 : index
    %c0_13 = arith.constant 0 : index
    %c0_14 = arith.constant 0 : index
    %c0_15 = arith.constant 0 : index
    %22 = vector.load %arg5[%c0_12, %c0_13, %c0_14, %c0_15] : memref<1x1x16x128xbf16, #tpu.memory_space<vmem>>, vector<1x1x16x128xbf16>
    %23 = vector.shape_cast %22 : vector<1x1x16x128xbf16> to vector<16x128xbf16>
    %24 = vector.shape_cast %21 : vector<16x128xbf16> to vector<1x1x16x128xbf16>
    tpu.vector_store %arg5[%c0_12, %c0_13, %c0_14, %c0_15], %24 {strides = array<i32>} : memref<1x1x16x128xbf16, #tpu.memory_space<vmem>>, vector<1x1x16x128xbf16>,
    %cst_16 = arith.constant dense<0.000000e+00> : vector<128xf32>
    %25 = vector.multi_reduction <add>, %20, %cst_16 [0] : vector<16x128xf32> to vector<128xf32>
    %26 = vector.shape_cast %25 : vector<128xf32> to vector<1x128xf32>
    %27 = arith.mulf %20, %20 : vector<16x128xf32>
    %cst_17 = arith.constant dense<0.000000e+00> : vector<128xf32>
    %28 = vector.multi_reduction <add>, %27, %cst_17 [0] : vector<16x128xf32> to vector<128xf32>
    %29 = vector.shape_cast %28 : vector<128xf32> to vector<1x128xf32>
    %30 = tpu.concatenate %26, %29 in 0 : vector<1x128xf32>, vector<1x128xf32> -> vector<2x128xf32>
    %c0_i32 = arith.constant 0 : i32
    %31 = arith.cmpi eq, %arg2, %c0_i32 : i32
    %32 = arith.extui %31 : i1 to i32
    %c0_i32_18 = arith.constant 0 : i32
    %33 = arith.cmpi ne, %32, %c0_i32_18 : i32
    scf.if %33 {
      %c0_21 = arith.constant 0 : index
      %c0_22 = arith.constant 0 : index
      %c0_23 = arith.constant 0 : index
      %c0_24 = arith.constant 0 : index
      %37 = vector.load %arg6[%c0_21, %c0_22, %c0_23, %c0_24] : memref<1x1x2x128xf32, #tpu.memory_space<vmem>>, vector<1x1x2x128xf32>
      %38 = vector.shape_cast %37 : vector<1x1x2x128xf32> to vector<2x128xf32>
      %39 = vector.shape_cast %30 : vector<2x128xf32> to vector<1x1x2x128xf32>
      tpu.vector_store %arg6[%c0_21, %c0_22, %c0_23, %c0_24], %39 {strides = array<i32>} : memref<1x1x2x128xf32, #tpu.memory_space<vmem>>, vector<1x1x2x128xf32>,
    } else {
    }
    %c0_i32_19 = arith.constant 0 : i32
    %34 = arith.cmpi sgt, %arg2, %c0_i32_19 : i32
    %35 = arith.extui %34 : i1 to i32
    %c0_i32_20 = arith.constant 0 : i32
    %36 = arith.cmpi ne, %35, %c0_i32_20 : i32
    scf.if %36 {
      %c0_21 = arith.constant 0 : index
      %c0_22 = arith.constant 0 : index
      %c0_23 = arith.constant 0 : index
      %c0_24 = arith.constant 0 : index
      %37 = vector.load %arg6[%c0_21, %c0_22, %c0_23, %c0_24] : memref<1x1x2x128xf32, #tpu.memory_space<vmem>>, vector<1x1x2x128xf32>
      %38 = vector.shape_cast %37 : vector<1x1x2x128xf32> to vector<2x128xf32>
      %39 = arith.addf %38, %30 : vector<2x128xf32>
      %c0_25 = arith.constant 0 : index
      %c0_26 = arith.constant 0 : index
      %c0_27 = arith.constant 0 : index
      %c0_28 = arith.constant 0 : index
      %40 = vector.load %arg6[%c0_25, %c0_26, %c0_27, %c0_28] : memref<1x1x2x128xf32, #tpu.memory_space<vmem>>, vector<1x1x2x128xf32>
      %41 = vector.shape_cast %40 : vector<1x1x2x128xf32> to vector<2x128xf32>
      %42 = vector.shape_cast %39 : vector<2x128xf32> to vector<1x1x2x128xf32>
      tpu.vector_store %arg6[%c0_25, %c0_26, %c0_27, %c0_28], %42 {strides = array<i32>} : memref<1x1x2x128xf32, #tpu.memory_space<vmem>>, vector<1x1x2x128xf32>,
    } else {
    }
    return
  }
  func.func @transform_0(%arg0: i32, %arg1: i32, %arg2: i32) -> (i32, i32, i32, i32) {
    %c0_i32 = arith.constant 0 : i32
    %c0_i32_0 = arith.constant 0 : i32
    %c0_i32_1 = arith.constant 0 : i32
    return %arg0, %arg1, %c0_i32, %c0_i32_0 : i32, i32, i32, i32
  }
  func.func @transform_1(%arg0: i32, %arg1: i32, %arg2: i32) -> (i32, i32, i32) {
    %c0_i32 = arith.constant 0 : i32
    %c0_i32_0 = arith.constant 0 : i32
    %c0_i32_1 = arith.constant 0 : i32
    %c0_i32_2 = arith.constant 0 : i32
    return %c0_i32, %c0_i32_0, %c0_i32_1 : i32, i32, i32
  }
  func.func @transform_2(%arg0: i32, %arg1: i32, %arg2: i32) -> (i32, i32, i32, i32) {
    %c0_i32 = arith.constant 0 : i32
    %c0_i32_0 = arith.constant 0 : i32
    return %arg0, %arg1, %arg2, %c0_i32 : i32, i32, i32, i32
  }
  func.func @transform_3(%arg0: i32, %arg1: i32, %arg2: i32) -> (i32, i32, i32, i32) {
    %c0_i32 = arith.constant 0 : i32
    %c0_i32_0 = arith.constant 0 : i32
    %c0_i32_1 = arith.constant 0 : i32
    return %arg0, %arg1, %c0_i32, %c0_i32_0 : i32, i32, i32, i32
  }
}

</mosaic_0001>

<bundles_post_ra>
// kernel: tpu_custom_call.1
= control target key start
LH: loop header
LB: loop body
LE: loop exit
PB: predicated region body
PF: predicated region fallthrough
CT: control target
= control target key end

     0   :  { %9 = vsyncpa [#allocation3], 0  ;;  %s1292_s0 = inlined_call_operand.vmem [shape: bf16[2,1,18,72], index: 0, kind: input, shape index: {}]   ;;  %s1293_s1 = inlined_call_operand.hbm [shape: bf16[3,72,128], index: 1, kind: input, shape index: {}]   ;;  %s1294_s2 = inlined_call_operand.hbm [shape: bf16[2,1,16,128], index: 2, kind: output, shape index: {0}]   ;;  %s1295_s3 = inlined_call_operand.hbm [shape: f32[2,1,2,128], index: 3, kind: output, shape index: {1}]  }
   0x1   :  { %10 = vsyncpa [#allocation4], 0 }
   0x2   :  { %12 = vsyncpa [#allocation4 + $0x1], 0 }
   0x3   :  { %13 = vsyncpa [#allocation7], 0 }
   0x4   :  { %15 = vsyncpa [#allocation7 + $0x1], 0  ;;  %s1103_s12 = smov 0   ;;  %s1105_s13 = smov 0  }
   0x5   :  { %s1107_s14 = smov 0   ;;  %s1109_s15 = smov 0  }
   0x6   :  { %s1111_s16 = smov 0   ;;  %s1113_s17 = smov 0  }
   0x7 LB: > { %s734_s18 = sadd.s32 4294967295, %s1072_s17   ;;  %s735_s19 = sadd.s32 4294967294, %s1072_s17   ;;  %s1072_s17 = sphi %s1113_s17, %s21_s17   ;;  %s1068_s16 = sphi %s1111_s16, %s1304_s16   ;;  %s1064_s15 = sphi %s1109_s15, %s1303_s15   ;;  %s1060_s14 = sphi %s1107_s14, %s1302_s14   ;;  %s1056_s13 = sphi %s1105_s13, %s1301_s13   ;;  %s1052_s12 = sphi %s1103_s12, %s1300_s12  }
   0x8   : > { %s40_s20 = sadd.s32 1, %s1068_s16  ;;  %s100_s21 = sadd.s32 1, %s1060_s14 }
   0x9   : > { %p42_p0 = scmp.ge.s32.totalorder %s40_s20, 2  ;;  %p110_p1 = scmp.ne.s32.totalorder %s1060_s14, %s1056_s13 }
   0xa   : > { %p111_p2 = scmp.eq.s32.totalorder %s734_s18, 1  ;;  %p116_p3 = scmp.ne.s32.totalorder %s1056_s13, %s1052_s12 }
   0xb   : > { %s1306_s20 = smov (%p42_p0, %s40_s20), 0  ;;  %p117_p5 = scmp.eq.s32.totalorder %s735_s19, 1 }
   0xc   : > { %p1143_p4 = por %p111_p2, %p110_p1  ;;  %s93_s23 = ssub.s32 %s1068_s16, %s1306_s20 }
   0xd   : > { %p736_p6 = scmp.ge.s32.totalorder %s1072_s17, 1  ;;  %p98_p7 = scmp.eq.s32.totalorder %s93_s23, 0 }
   0xe   : > { %p1150_p8 = por %p117_p5, %p116_p3  ;;  %p152_p9 = scmp.lt.s32.totalorder %s1072_s17, 3 }
   0xf   : > { %s1156_s25 = scalar_select %p98_p7, %s1060_s14, %s100_s21  }
  0x10   : > { %p1158_p10 = pnand %p736_p6, %p152_p9  ;;  %p1162_p11 = scmp.eq.s32.totalorder %s734_s18, 0 }
  0x11   : > { %s1074_s28 = smov [#allocation2]  }
  0x12   : > { %p850_p12 = pneg %p1158_p10  ;;  %s164_s29 = sshll.u32 %s1074_s28, 4  ;;  %s165_s29 = int_to_ptr.vmem [resolvable:$true] %s164_s29 }
  0x13   : > { %s947_s30 = scalar_lea.vmem %s165_s29, 1728  ;;  %p955_p5 = scmp.lt.s32.totalorder %s165_s29, %s165_s29 }
  0x14   : > { %p851_p13 = pnand %p1162_p11, %p850_p12  ;;  %p948_p1 = scmp.ne.s32.totalorder %s165_s29, %s947_s30 }
  0x15   : > { %p956_p6 = scmp.lt.s32.totalorder %s947_s30, %s947_s30 }
  0x16   : > { %p938_p0 = pneg %p851_p13 }
  0x17   : > { %p957_p7 = por %p956_p6, %p955_p5 }
  0x18   : > { %p950_p2 = pnand %p948_p1, %p938_p0 }
  0x1a   : > { %p951_p3 = pneg %p950_p2 }
  0x1c   : > { %p958_p9 = pnand %p957_p7, %p951_p3 }
  0x1e   : > { %961 = shalt.err (!%p958_p9)
}
  0x1f   : > { %s1075_s4 = smov 64   ;;  %s1076_s5 = smov 4  }
  0x20   : > { %853 = dma.hbm_to_vmem [thread:$0]  (!%p851_p13), %s1293_s1, 1728, %s165_s29, [#allocation3], %s1075_s4, %s1075_s4, %s1076_s5  }
  0x21   : > { %192 = sbr.rel (%p1158_p10) target bundleno = 320 (0x140), region = 28 }
  0x26   : > { %1039 = dma.done.wait (%p1162_p11), [#allocation3], 1728  }
  0x27   : > { %1041 = vsyncadd (%p1162_p11), [#allocation3], 4294965568  ;;  %v1077_v0 = vmov 0.0   ;;  %p225_p12 = scmp.lt.s32.totalorder %s1064_s15, 1  ;;  %vm1078_vm0 = vmmov 0   ;;  %vm315_vm1 = vcmask 1043456  }
  0x28   : > { %799 = vmatprep.subr.bf16.mxu0 %v1077_v0  ;;  %813 = vmatprep.subr.bf16.mxu1 %v1077_v0  ;;  %v919_v1 = vld [vmem:[#allocation2 + $0x44] ss:$0 sps:$4 sm:$0xff]   ;;  %v920_v2 = vld [vmem:[#allocation2 + $0x20] ss:$0 sps:$4 sm:$0xff]   ;;  %v922_v6 = vld [vmem:[#allocation2 + $0x18] sm:$0xff]   ;;  %vm311_vm3 = vcmask 588800  }
  0x29   : > { %809 = vmatprep.mubr.msk.bf16.mxu0 %vm1078_vm0, %v1077_v0  ;;  %823 = vmatprep.mubr.msk.bf16.mxu1 %vm1078_vm0, %v1077_v0  ;;  %s226_s8 = scalar_select %p225_p12, %s1064_s15, 1  ;;  %v317_v3 = vsel %vm315_vm1, %v919_v1, 0  ;;  %v390_v4 = vsel %vm315_vm1, %v920_v2, 0  ;;  %v921_v5 = vld [vmem:[#allocation2 + $0x3c] sm:$0xff]   ;;  %v923_v7 = vld [vmem:[#allocation2 + $0x34] sm:$0xff]   ;;  %v925_v11 = vld [vmem:[#allocation2 + $0x2c] sm:$0xff]  }
  0x2a   : > { %800 = vmatpush3.bf16.msra.mxu0 %v317_v3  ;;  %814 = vmatpush3.bf16.msra.mxu1 %v390_v4  ;;  %v924_v8 = vld [vmem:[#allocation2 + $0x10] sm:$0xff]   ;;  %v926_v12 = vld [vmem:[#allocation2 + $0x8] sm:$0xff]   ;;  %v928_v19 = vld [vmem:[#allocation2] sm:$0xff]   ;;  %vm271_vm2 = vsmask.f32 7424  ;;  %vm443_vm4 = vcmask 1046528  }
  0x2b   : > { %s841_s9 = smul.u32 12, %s226_s8  ;;  %801 = vmatprep.subr.bf16.mxu0 %v1077_v0  ;;  %815 = vmatprep.subr.bf16.mxu1 %v1077_v0  ;;  %v927_v17 = vld [vmem:[#allocation2 + $0x24] sm:$0xff]   ;;  %v933_v25 = vld [vmem:[#allocation2 + $0x58] sm:$0xff]   ;;  %v934_v26 = vld [vmem:[#allocation2 + $0x50] sm:$0xff]   ;;  %s1212_s19 = sand.u32 1, %s1056_s13  }
  0x2c   : > { %v931_v21 = vld [vmem:[#allocation2 + $0x68] ss:$0 sps:$4 sm:$0xff]   ;;  %v932_v24 = vld [vmem:[#allocation2 + $0x60] sm:$0xff]   ;;  %s741_s21 = sshll.u32 %s1212_s19, 3  ;;  %s775_s23 = sshll.u32 %s1064_s15, 7 }
  0x2d   : > { %s233_s18 = scalar_lea.vmem %s1292_s0, %s841_s9  ;;  %v478_v23 = vsel %vm315_vm1, %v931_v21, 0  ;;  %v935_v27 = vld [vmem:[#allocation2 + $0x48] sm:$0xff]   ;;  %s217_s26 = scalar_lea.vmem [#allocation5], %s741_s21 }
  0x2e   : > { %802 = vmatpush3.bf16.msra.mxu0 %v921_v5  ;;  %816 = vmatpush3.bf16.msra.mxu1 %v922_v6  ;;  %v929_v9 = vld [vmem:[%s233_s18] sm:$0xff]   ;;  %v930_v10 = vld [vmem:[%s233_s18 + $0x8] ss:$0 sps:$4 sm:$0x11]   ;;  %s586_s27 = sshll.u32 %s217_s26, 4  ;;  %s1219_s30 = scalar_lea.hbm %s1294_s2, %s775_s23  ;;  %s1221_s27 = int_to_ptr.vmem [resolvable:$true] %s586_s27 }
  0x2f   : > { %803 = vmatprep.subr.bf16.mxu0 %v1077_v0  ;;  %817 = vmatprep.subr.bf16.mxu1 %v1077_v0  ;;  %v273_v13 = vshrl.u32 %v929_v9, 16  ;;  %v275_v14 = vshll.u32 %v929_v9, 16  ;;  %v280_v15 = vshll.u32 %v930_v10, 16  ;;  %v444_v28 = vrot.slane %v929_v9, 1  ;;  %s564_s4 = scalar_lea.sflag [#allocation4], %s1212_s19  ;;  %s962_s5 = scalar_lea.vmem %s1221_s27, 128 }
  0x30   : > { %v445_v29 = vrot.slane %v930_v10, 1  ;;  %p963_p10 = scmp.ne.s32.totalorder %s1221_s27, %s962_s5  ;;  %s1079_s6 = smov [#allocation5]  }
  0x31   : > { %v277_v16 = vrot.slane %v275_v14, 1  ;;  %v282_v18 = vrot.slane %v280_v15, 1  ;;  %s966_s7 = sshll.u32 %s1079_s6, 4  ;;  %s967_s7 = int_to_ptr.vmem [resolvable:$false] %s966_s7 }
  0x32   : > { %804 = vmatpush3.bf16.msra.mxu0 %v923_v7  ;;  %818 = vmatpush3.bf16.msra.mxu1 %v924_v8  ;;  %v446_v30 = vsel %vm443_vm4, %v444_v28, %v445_v29  ;;  %p964_p11 = pnand %p963_p10, %p1143_p4  ;;  %s968_s8 = scalar_lea.vmem %s967_s7, 256 }
  0x33   : > { %805 = vmatprep.subr.bf16.mxu0 %v1077_v0  ;;  %819 = vmatprep.subr.bf16.mxu1 %v1077_v0  ;;  %v278_v20 = vor.u32 %v277_v16, %v273_v13  ;;  %p969_p0 = scmp.lt.s32.totalorder %s1221_s27, %s967_s7  ;;  %p970_p1 = scmp.lt.s32.totalorder %s968_s8, %s962_s5 }
  0x34   : > { %p965_p13 = pneg %p964_p11 }
  0x35   : > { %v283_v22 = vsel %vm271_vm2, %v278_v20, %v282_v18  ;;  %p971_p2 = por %p970_p1, %p969_p0 }
  0x36   : > { %806 = vmatpush3.bf16.msra.mxu0 %v925_v11  ;;  %820 = vmatpush3.bf16.msra.mxu1 %v926_v12 }
  0x37   : > { %807 = vmatprep.subr.bf16.mxu0 %v1077_v0  ;;  %821 = vmatprep.subr.bf16.mxu1 %v1077_v0  ;;  %p972_p3 = pnand %p971_p2, %p965_p13 }
  0x3a   : > { %808 = vmatpush3.bf16.msra.mxu0 %v927_v17  ;;  %822 = vmatpush3.bf16.msra.mxu1 %v928_v19 }
  0x3b   : > { %827 = vmatprep.subr.bf16.mxu0 %v1077_v0 }
  0x3d   : > { %810 = vmatmul.mubr.msk.bf16.vlgmr.msra.gmra.mxu0 %vm311_vm3, %v283_v22  ;;  %824 = vmatmul.mubr.msk.bf16.vlgmr.msra.gmra.mxu1 %vm311_vm3, %v929_v9 }
  0x3e   : > { %828 = vmatpush3.bf16.msra.mxu0 %v478_v23  ;;  %837 = vmatprep.mubr.msk.bf16.mxu0 %vm1078_vm0, %v1077_v0 }
  0x3f   : > { %829 = vmatprep.subr.bf16.mxu0 %v1077_v0 }
  0x42   : > { %830 = vmatpush3.bf16.msra.mxu0 %v932_v24 }
  0x43   : > { %831 = vmatprep.subr.bf16.mxu0 %v1077_v0 }
  0x46   : > { %832 = vmatpush3.bf16.msra.mxu0 %v933_v25 }
  0x47   : > { %833 = vmatprep.subr.bf16.mxu0 %v1077_v0 }
  0x4a   : > { %834 = vmatpush3.bf16.msra.mxu0 %v934_v26 }
  0x4b   : > { %835 = vmatprep.subr.bf16.mxu0 %v1077_v0 }
  0x4e   : > { %836 = vmatpush3.bf16.msra.mxu0 %v935_v27 }
  0x51   : > { %838 = vmatmul.mubr.msk.bf16.vlgmr.msra.gmra.mxu0 %vm311_vm3, %v446_v30 }
  0xfd   : > { %v353_v31 = vpop.f32.mrf.mxu0  ;;  %v426_v32 = vpop.f32.mrf.mxu1 }
  0xfe   : > { %v427_v40 = vadd.f32 %v426_v32, %v353_v31 }
  0xff   : > { %v811_v33 = vpop.f32.mrf.mxu0  ;;  %v825_v34 = vpop.f32.mrf.mxu1 }
 0x101   : > { %v356_v35 = vpop.f32.mrf.mxu0  ;;  %v429_v36 = vpop.f32.mrf.mxu1 }
 0x102   : > { %v430_v42 = vadd.f32 %v429_v36, %v356_v35 }
 0x103   : > { %v812_v37 = vpop.f32.mrf.mxu0  ;;  %v826_v38 = vpop.f32.mrf.mxu1 }
 0x111   : > { %v514_v39 = vpop.f32.mrf.mxu0 }
 0x112   : > { %v521_v43 = vadd.f32 %v514_v39, %v427_v40 }
 0x113   : > { %v839_v41 = vpop.f32.mrf.mxu0 }
 0x114   : > { %v540_v47 = vmul.f32 %v521_v43, %v521_v43 }
 0x115   : > { %v517_v44 = vpop.f32.mrf.mxu0 }
 0x116   : > { %v522_v45 = vadd.f32 %v517_v44, %v430_v42 }
 0x117   : > { %v840_v46 = vpop.f32.mrf.mxu0 }
 0x118   : > { %v779_v48 = vpack.c.bf16 %v522_v45, %v521_v43  ;;  %v533_v49 = vadd.f32 %v522_v45, %v521_v43  ;;  %v541_v50 = vmul.f32 %v522_v45, %v522_v45 }
 0x11a   : > { %780 = vst [vmem:[%s217_s26] sm:$0xff] %v779_v48   ;;  %v534_v51 = vrot.slane %v533_v49, 4  ;;  %v542_v52 = vadd.f32 %v541_v50, %v540_v47 }
 0x11b   : > { %975 = shalt.err (!%p972_p3)
}
 0x11c   : > { %s976_s9 = scalar_lea.hbm %s1219_s30, 128  ;;  %s980_s18 = scalar_lea.hbm %s1294_s2, 256 }
 0x11d   : > { %p977_p5 = scmp.ne.s32.totalorder %s1219_s30, %s976_s9  ;;  %p981_p9 = scmp.lt.s32.totalorder %s1219_s30, %s1294_s2 }
 0x11e   : > { %p982_p12 = scmp.lt.s32.totalorder %s980_s18, %s976_s9 }
 0x11f   : > { %p978_p6 = pnand %p977_p5, %p1143_p4 }
 0x120   : > { %p983_p10 = por %p982_p12, %p981_p9 }
 0x121   : > { %p979_p7 = pneg %p978_p6 }
 0x123   : > { %p984_p11 = pnand %p983_p10, %p979_p7 }
 0x125   : > { %987 = shalt.err (!%p984_p11)
}
 0x126   : > { %s1080_s26 = smov 64   ;;  %s1081_s28 = smov 4   ;;  %v535_v53 = vadd.f32 %v534_v51, %v533_v49  ;;  %v543_v54 = vrot.slane %v542_v52, 4  ;;  %vm549_vm5 = vcmask 1040384  }
 0x127   : > { %846 = dma.vmem_to_hbm [thread:$0]  (%p1143_p4), %s1221_s27, 128, %s1219_s30, %s564_s4, %s1080_s26, %s1080_s26, %s1081_s28  }
 0x128   : > { %v536_v55 = vrot.slane %v535_v53, 2  ;;  %v544_v56 = vadd.f32 %v543_v54, %v542_v52  ;;  %s742_s29 = sshll.u32 %s1212_s19, 1  ;;  %s770_s5 = sshll.u32 %s1064_s15, 5 }
 0x129   : > { %s224_s6 = scalar_lea.vmem [#allocation6], %s742_s29  ;;  %s1251_s30 = scalar_lea.hbm %s1295_s3, %s770_s5 }
 0x12a   : > { %v537_v57 = vadd.f32 %v536_v55, %v535_v53  ;;  %v545_v58 = vrot.slane %v544_v56, 2  ;;  %s603_s7 = sshll.u32 %s224_s6, 4  ;;  %s569_s4 = scalar_lea.sflag [#allocation7], %s1212_s19  ;;  %s604_s7 = int_to_ptr.vmem [resolvable:$true] %s603_s7 }
 0x12b   : > { %s988_s9 = scalar_lea.vmem %s604_s7, 32  ;;  %s1082_s15 = smov [#allocation6]  }
 0x12c   : > { %v538_v59 = vrot.slane %v537_v57, 1  ;;  %v546_v60 = vadd.f32 %v545_v58, %v544_v56  ;;  %p989_p13 = scmp.ne.s32.totalorder %s604_s7, %s988_s9  ;;  %s992_s10 = sshll.u32 %s1082_s15, 4  ;;  %s993_s10 = int_to_ptr.vmem [resolvable:$false] %s992_s10 }
 0x12d   : > { %s994_s11 = scalar_lea.vmem %s993_s10, 64  ;;  %p995_p2 = scmp.lt.s32.totalorder %s604_s7, %s993_s10 }
 0x12e   : > { %v547_v61 = vrot.slane %v546_v60, 1  ;;  %v539_v62 = vadd.f32 %v538_v59, %v537_v57  ;;  %p990_p0 = pnand %p989_p13, %p1143_p4  ;;  %p996_p3 = scmp.lt.s32.totalorder %s994_s11, %s988_s9 }
 0x130   : > { %v548_v63 = vadd.f32 %v547_v61, %v546_v60  ;;  %p991_p1 = pneg %p990_p0  ;;  %p997_p5 = por %p996_p3, %p995_p2 }
 0x132   : > { %v550_v0 = vsel %vm549_vm5, %v539_v62, %v548_v63  ;;  %p998_p6 = pnand %p997_p5, %p991_p1 }
 0x133   : > { %555 = vst [vmem:[%s224_s6] sm:$0x3] %v550_v0 }
 0x134   : > { %1001 = shalt.err (!%p998_p6)
}
 0x135   : > { %s1002_s18 = scalar_lea.hbm %s1251_s30, 32  ;;  %s1006_s23 = scalar_lea.hbm %s1295_s3, 64 }
 0x136   : > { %p1003_p7 = scmp.ne.s32.totalorder %s1251_s30, %s1002_s18  ;;  %p1007_p10 = scmp.lt.s32.totalorder %s1251_s30, %s1295_s3 }
 0x137   : > { %p1008_p11 = scmp.lt.s32.totalorder %s1006_s23, %s1002_s18 }
 0x138   : > { %p1004_p9 = pnand %p1003_p7, %p1143_p4 }
 0x139   : > { %p1009_p13 = por %p1008_p11, %p1007_p10 }
 0x13a   : > { %p1005_p12 = pneg %p1004_p9 }
 0x13c   : > { %p1010_p0 = pnand %p1009_p13, %p1005_p12 }
 0x13e   : > { %1013 = shalt.err (!%p1010_p0)
}
 0x13f   : > { %847 = dma.vmem_to_hbm [thread:$0]  (%p1143_p4), %s604_s7, 32, %s1251_s30, %s569_s4  }
 0x140 PF: > { %p863_p1 = scmp.ge.s32.totalorder %s1072_s17, 2  ;;  %s615_s29 = sand.u32 1, %s1052_s12  }
 0x141   : > { %s616_s5 = scalar_lea.sflag [#allocation4], %s615_s29 }
 0x142   : > { %p855_p2 = pnand %p863_p1, %p1150_p8 }
 0x144   : > { %p856_p3 = pneg %p855_p2 }
 0x146   : > { %1043 = dma.done.wait (%p856_p3), %s616_s5, 128  }
 0x147   : > { %1045 = vsyncadd (%p856_p3), %s616_s5, 4294967168  ;;  %s625_s6 = scalar_lea.sflag [#allocation7], %s615_s29 }
 0x148   : > { %1047 = dma.done.wait (%p856_p3), %s625_s6, 32  }
 0x149   : > { %1049 = vsyncadd (%p856_p3), %s625_s6, 4294967264  ;;  %s21_s17 = sadd.s32 1, %s1072_s17   ;;  %s1300_s12 = smov %s1056_s13 }
 0x14a   : > { %p18_p5 = scmp.ge.s32.totalorder %s21_s17, 4   ;;  %s1301_s13 = smov %s1060_s14 }
 0x14b   : > { %s1302_s14 = smov %s1156_s25  ;;  %s1303_s15 = smov %s1068_s16 }
 0x14c   : > { %s1304_s16 = smov %s1306_s20  ;;  %20 = sbr.rel (!%p18_p5) target bundleno = 7 (0x7), region = 96 }
 0x151   :  { %630 = vsyncpa [#allocation3], 1 }
 0x152   :  { %632 = vsyncpa [#allocation3 + $0x1], 1 }
 0x153   :  { %633 = vsyncpa [#allocation4], 1 }
 0x154   :  { %635 = vsyncpa [#allocation4 + $0x1], 1 }
 0x155   :  { %636 = vsyncpa [#allocation7], 1 }
 0x156   :  { %638 = vsyncpa [#allocation7 + $0x1], 1 }

</bundles_post_ra>
